<compile_context>
chip_gen: v6e
topology: v6e:2x2x1
jax: 0.10.0
libtpu: 0.0.40
codegen_flags: <defaults>
</compile_context>

<pallas_src>
import functools

import jax
import jax.numpy as jnp
from jax import lax
from jax.experimental import pallas as pl
from jax.experimental.pallas import tpu as pltpu


# Tile budget: fits comfortably under a 32 MiB scoped-VMEM limit on every gen
# (v7x has only 64 MiB physical VMEM, so stay well clear of it).
_VMEM_BUDGET_BYTES = 24 * 1024 * 1024
_VMEM_LIMIT_BYTES = 32 * 1024 * 1024


def _round_up(n, m):
    return ((n + m - 1) // m) * m


def _pick_batch_tile(B, S, H, x_bytes, block_b, budget):
    """Largest 128-multiple batch tile whose VMEM footprint fits the budget."""
    b_ceil = _round_up(max(B, 1), 128)

    def vmem_bytes(tb):
        return (2 * tb * S * x_bytes          # x tile (double-buffered)
                + 2 * (H * S * x_bytes + 2 * H * 4)  # resident weights/bias (conservative)
                + H * tb * 4                  # h = (H, tb) f32 intermediate
                + 2 * tb * 4)                 # output slab (double-buffered)

    tb = max(128, min(_round_up(block_b, 128), b_ceil))
    while tb > 128 and vmem_bytes(tb) > budget:
        tb -= 128
    # v7x megacore: prefer >= 2 grid steps so the "parallel" batch axis can
    # actually be sharded across the two TensorCores.
    if tb >= b_ceil and b_ceil >= 256:
        tb = _round_up(pl.cdiv(b_ceil, 2), 128)
    return tb


def value_net_kernel(x_ref, w1_ref, b1_ref, w2_ref, b2_ref, out_ref, *, mxu_dtype):
    # x tile arrives row-major (tb, S); cast only the MXU operand (f32 kept for
    # bias / ReLU / fc2 so v5e's f32-only VPU path is unaffected).
    x_t = x_ref[...].astype(mxu_dtype)                       # (tb, S)
    # fc1: w1 @ x^T -> (H, tb) on the MXU, f32 accumulation.  Contracting the
    # trailing dim of both operands lets Mosaic do the relayout on-chip.
    h = lax.dot_general(w1_ref[...], x_t, (((1,), (1,)), ((), ())),
                        preferred_element_type=jnp.float32)  # (H, tb)
    h = jnp.maximum(h + b1_ref[...], 0.0)                    # bias bcast over lanes, ReLU on VPU
    # fc2 without an N=1 MXU matmul: multiply by the (H, 1) weight column and
    # reduce over sublanes (VPU/XLU) -> lane-dense (1, tb) result.
    v = jnp.sum(h * w2_ref[...], axis=0, keepdims=True)      # (1, tb)
    out_ref[...] = (v + b2_ref[0]).astype(out_ref.dtype)


@functools.partial(jax.jit, static_argnames=("block_b", "mxu_bf16"))
def value_net_forward(x, w1, b1, w2, b2, *, block_b=8192, mxu_bf16=True):
    """x: (B, S); PyTorch-layout params: w1 (H, S), b1 (H,), w2 (1, H), b2 (1,).
    Returns (B, 1) f32, matching ValueNet.forward."""
    B, S = x.shape
    H = w1.shape[0]
    mxu_dtype = jnp.bfloat16 if mxu_bf16 else jnp.float32

    x_bytes = jnp.dtype(x.dtype).itemsize
    tb = _pick_batch_tile(B, S, H, x_bytes, block_b, _VMEM_BUDGET_BYTES)
    n_tiles = pl.cdiv(B, tb)
    # TODO(synk): if H grows very large (>=512) with huge tb, split fc1 over an
    # inner H-chunk fori_loop so the (H, tb) intermediate stays a few MiB; the
    # budget-driven tb shrink above already keeps it legal, just less optimal.

    w1_k = w1.astype(mxu_dtype)                       # (H, S) tiny, VMEM-resident
    b1_col = b1.reshape(H, 1).astype(jnp.float32)
    w2_col = w2.reshape(H, 1).astype(jnp.float32)
    b2_s = b2.reshape(1).astype(jnp.float32)          # 1-D scalar in SMEM

    flops = 2 * B * S * H + 5 * B * H
    bytes_accessed = (x.size * x_bytes
                      + w1_k.size * jnp.dtype(mxu_dtype).itemsize
                      + (b1_col.size + w2_col.size + 1) * 4
                      + n_tiles * tb * 4)

    out = pl.pallas_call(
        functools.partial(value_net_kernel, mxu_dtype=mxu_dtype),
        out_shape=jax.ShapeDtypeStruct((1, n_tiles * tb), jnp.float32),
        grid_spec=pltpu.PrefetchScalarGridSpec(
            num_scalar_prefetch=0,
            grid=(n_tiles,),
            in_specs=[
                # x streams over the batch axis (auto double-buffered); the
                # tail block is partial — no host-side padding of x.
                pl.BlockSpec((tb, S), lambda i: (i, 0)),
                # Weights / fc1 bias / fc2 weight stay resident in VMEM.
                pl.BlockSpec((H, S), lambda i: (0, 0)),
                pl.BlockSpec((H, 1), lambda i: (0, 0)),
                pl.BlockSpec((H, 1), lambda i: (0, 0)),
                # fc2 bias: 1-D scalar in SMEM (no padded VMEM tile).
                pl.BlockSpec(memory_space=pltpu.MemorySpace.SMEM),
            ],
            out_specs=pl.BlockSpec((1, tb), lambda i: (0, i)),
        ),
        compiler_params=pltpu.CompilerParams(
            dimension_semantics=("parallel",),        # batch axis: shard across TCs
            vmem_limit_bytes=_VMEM_LIMIT_BYTES,       # v5e default scope is only 16 MiB
        ),
        cost_estimate=pl.CostEstimate(
            flops=flops, transcendentals=0, bytes_accessed=bytes_accessed),
    )(x, w1_k, b1_col, w2_col, b2_s)

    # Lane-dense (1, n*tb) slab -> (B, 1); padded tail lanes are dropped here.
    return out[0, :B].reshape(B, 1)


def init_params(key, state_dim, hidden_dim):
    """Deterministic init with PyTorch nn.Linear shapes."""
    k1, k2, k3, k4 = jax.random.split(key, 4)
    lim1 = 1.0 / jnp.sqrt(state_dim)
    lim2 = 1.0 / jnp.sqrt(hidden_dim)
    w1 = jax.random.uniform(k1, (hidden_dim, state_dim), jnp.float32, -lim1, lim1)
    b1 = jax.random.uniform(k2, (hidden_dim,), jnp.float32, -lim1, lim1)
    w2 = jax.random.uniform(k3, (1, hidden_dim), jnp.float32, -lim2, lim2)
    b2 = jax.random.uniform(k4, (1,), jnp.float32, -lim2, lim2)
    return w1, b1, w2, b2


def reference_forward(x, w1, b1, w2, b2):
    h = jnp.maximum(x @ w1.T + b1, 0.0)
    return h @ w2.T + b2


if __name__ == "__main__":
    batch = 8
    state_dim = 16
    hidden_dim = 32

    key = jax.random.PRNGKey(0)
    kx, kp = jax.random.split(key)
    x = jax.random.normal(kx, (batch, state_dim), jnp.float32)
    w1, b1, w2, b2 = init_params(kp, state_dim, hidden_dim)
    ref = reference_forward(x, w1, b1, w2, b2)

    # Default path: bf16 MXU operands, f32 accumulation (looser tolerance).
    out = jax.block_until_ready(value_net_forward(x, w1, b1, w2, b2))
    assert out.shape == (batch, 1), out.shape
    assert jnp.allclose(out, ref, atol=2e-2, rtol=2e-2), (out, ref)

    # Full-f32 path: bit-tight check against the reference.
    out32 = jax.block_until_ready(value_net_forward(x, w1, b1, w2, b2, mxu_bf16=False))
    assert jnp.allclose(out32, ref, atol=1e-5, rtol=1e-5), (out32, ref)

    print("KERNEL_OK")
</pallas_src>

<mosaic_0001>
module attributes {stable_mosaic.version = 11 : i64} {
  func.func @value_net_kernel(%arg0: i32, %arg1: memref<128x16xf32, #tpu.memory_space<vmem>>, %arg2: memref<32x16xbf16, #tpu.memory_space<vmem>>, %arg3: memref<32x1xf32, #tpu.memory_space<vmem>>, %arg4: memref<32x1xf32, #tpu.memory_space<vmem>>, %arg5: memref<1xf32, #tpu.memory_space<smem>>, %arg6: memref<1x128xf32, #tpu.memory_space<vmem>>) attributes {dimension_semantics = [#tpu.dimension_semantics<parallel>], iteration_bounds = array<i64: 1>, scalar_prefetch = 0 : i64, scratch_operands = 0 : i64, tpu.core_type = #tpu.core_type<tc>, window_params = [{transform_indices = @transform_0, window_bounds = array<i64: 128, 16>}, {pipeline_mode = #tpu.pipeline_mode<synchronous>, transform_indices = @transform_1, window_bounds = array<i64: 32, 16>}, {pipeline_mode = #tpu.pipeline_mode<synchronous>, transform_indices = @transform_2, window_bounds = array<i64: 32, 1>}, {pipeline_mode = #tpu.pipeline_mode<synchronous>, transform_indices = @transform_3, window_bounds = array<i64: 32, 1>}, {transform_indices = @transform_4, window_bounds = array<i64: 1>}, {transform_indices = @transform_5, window_bounds = array<i64: 1, 128>}]} {
    %c0 = arith.constant 0 : index
    %c0_0 = arith.constant 0 : index
    %0 = vector.load %arg1[%c0, %c0_0] : memref<128x16xf32, #tpu.memory_space<vmem>>, vector<128x16xf32>
    %1 = arith.truncf %0 : vector<128x16xf32> to vector<128x16xbf16>
    %c0_1 = arith.constant 0 : index
    %c0_2 = arith.constant 0 : index
    %2 = vector.load %arg2[%c0_1, %c0_2] : memref<32x16xbf16, #tpu.memory_space<vmem>>, vector<32x16xbf16>
    %cst = arith.constant dense<0.000000e+00> : vector<32x128xf32>
    %3 = tpu.matmul %2, %1, %cst {dimension_numbers = #tpu.dot_dimension_numbers<[1], [1], [0], [0], [0, 0, 1, 0], [], []>} : vector<32x16xbf16>, vector<128x16xbf16>, vector<32x128xf32> -> vector<32x128xf32>
    %c0_3 = arith.constant 0 : index
    %c0_4 = arith.constant 0 : index
    %4 = vector.load %arg3[%c0_3, %c0_4] : memref<32x1xf32, #tpu.memory_space<vmem>>, vector<32x1xf32>
    %5 = vector.broadcast %4 : vector<32x1xf32> to vector<32x128xf32>
    %6 = arith.addf %3, %5 : vector<32x128xf32>
    %cst_5 = arith.constant 0.000000e+00 : f32
    %7 = vector.broadcast %cst_5 : f32 to vector<32x128xf32>
    %8 = arith.maximumf %6, %7 : vector<32x128xf32>
    %c0_6 = arith.constant 0 : index
    %c0_7 = arith.constant 0 : index
    %9 = vector.load %arg4[%c0_6, %c0_7] : memref<32x1xf32, #tpu.memory_space<vmem>>, vector<32x1xf32>
    %10 = vector.broadcast %9 : vector<32x1xf32> to vector<32x128xf32>
    %11 = arith.mulf %8, %10 : vector<32x128xf32>
    %cst_8 = arith.constant dense<0.000000e+00> : vector<128xf32>
    %12 = vector.multi_reduction <add>, %11, %cst_8 [0] : vector<32x128xf32> to vector<128xf32>
    %13 = vector.shape_cast %12 : vector<128xf32> to vector<1x128xf32>
    %c0_9 = arith.constant 0 : index
    %14 = memref.load %arg5[%c0_9] : memref<1xf32, #tpu.memory_space<smem>>
    %15 = vector.broadcast %14 : f32 to vector<1x128xf32>
    %16 = arith.addf %13, %15 : vector<1x128xf32>
    %c0_10 = arith.constant 0 : index
    %c0_11 = arith.constant 0 : index
    %17 = vector.load %arg6[%c0_10, %c0_11] : memref<1x128xf32, #tpu.memory_space<vmem>>, vector<1x128xf32>
    tpu.vector_store %arg6[%c0_10, %c0_11], %16 {strides = array<i32>} : memref<1x128xf32, #tpu.memory_space<vmem>>, vector<1x128xf32>,
    return
  }
  func.func @transform_0(%arg0: i32) -> (i32, i32) {
    %c0_i32 = arith.constant 0 : i32
    %c0_i32_0 = arith.constant 0 : i32
    return %arg0, %c0_i32 : i32, i32
  }
  func.func @transform_1(%arg0: i32) -> (i32, i32) {
    %c0_i32 = arith.constant 0 : i32
    %c0_i32_0 = arith.constant 0 : i32
    %c0_i32_1 = arith.constant 0 : i32
    return %c0_i32, %c0_i32_0 : i32, i32
  }
  func.func @transform_2(%arg0: i32) -> (i32, i32) {
    %c0_i32 = arith.constant 0 : i32
    %c0_i32_0 = arith.constant 0 : i32
    %c0_i32_1 = arith.constant 0 : i32
    return %c0_i32, %c0_i32_0 : i32, i32
  }
  func.func @transform_3(%arg0: i32) -> (i32, i32) {
    %c0_i32 = arith.constant 0 : i32
    %c0_i32_0 = arith.constant 0 : i32
    %c0_i32_1 = arith.constant 0 : i32
    return %c0_i32, %c0_i32_0 : i32, i32
  }
  func.func @transform_4(%arg0: i32) -> i32 {
    %c0_i32 = arith.constant 0 : i32
    %c0_i32_0 = arith.constant 0 : i32
    return %c0_i32 : i32
  }
  func.func @transform_5(%arg0: i32) -> (i32, i32) {
    %c0_i32 = arith.constant 0 : i32
    %c0_i32_0 = arith.constant 0 : i32
    return %c0_i32, %arg0 : i32, i32
  }
}

</mosaic_0001>

<bundles_post_ra>
// kernel: value_net_forward.1
= control target key start
LH: loop header
LB: loop body
LE: loop exit
PB: predicated region body
PF: predicated region fallthrough
CT: control target
= control target key end

     0   :  { %vm84_vm0 = vcmask 130048   ;;  %v260_v3 = vmov 0   ;;  %s393_s0 = inlined_call_operand.vmem [shape: f32[8,16], index: 0, kind: input, shape index: {}]   ;;  %s394_s1 = inlined_call_operand.vmem [shape: bf16[32,16], index: 1, kind: input, shape index: {}]   ;;  %s395_s2 = inlined_call_operand.vmem [shape: f32[32,1], index: 2, kind: input, shape index: {}]   ;;  %s396_s3 = inlined_call_operand.vmem [shape: f32[32,1], index: 3, kind: input, shape index: {}]   ;;  %s397_s4 = inlined_call_operand.<no memory space> [shape: f32[1], index: 4, kind: input, shape index: {}]   ;;  %s398_s5 = inlined_call_operand.vmem [shape: f32[1,128], index: 5, kind: output, shape index: {}]  }
   0x1   :  { %v36_v0 = vld [vmem:[%s393_s0 + $0x70] sm:$0xff]  ;;  %v37_v1 = vld [vmem:[%s393_s0 + $0x78] sm:$0xff]  ;;  %v34_v2 = vld [vmem:[%s393_s0 + $0x60] sm:$0xff]  ;;  %256 = vset.pattern.permute.xlu0 %v260_v3  ;;  %257 = vset.pattern.permute.xlu1 %v260_v3 }
   0x2   :  { %v45_v4 = vpack.c.bf16 %v37_v1, %v36_v0  ;;  %v35_v5 = vld [vmem:[%s393_s0 + $0x68] sm:$0xff]  ;;  %v32_v8 = vld [vmem:[%s393_s0 + $0x50] sm:$0xff]  ;;  %v33_v9 = vld [vmem:[%s393_s0 + $0x58] sm:$0xff] }
   0x3   :  { %v44_v6 = vpack.c.bf16 %v35_v5, %v34_v2  ;;  %v258_v10 = vld [vmem:[%s394_s1] sm:$0xff]   ;;  %v52_v12 = vld [vmem:[%s395_s2 + $0x10] sm:$0xff]  ;;  %v43_v14 = vpack.c.bf16 %v33_v9, %v32_v8  ;;  %v51_v15 = vld [vmem:[%s395_s2 + $0x8] sm:$0xff] }
   0x4   :  { %247 = vmatprep.subr.msk.bf16.mxu0 %vm84_vm0, %v45_v4  ;;  %v113_v7 = vsel %vm84_vm0, %v45_v4, 0  ;;  %v50_v11 = vld [vmem:[%s395_s2] sm:$0xff]  ;;  %243 = vmatprep.mubr.msk.bf16.mxu0 %vm84_vm0, %v258_v10  ;;  %v53_v16 = vld [vmem:[%s395_s2 + $0x18] sm:$0xff]  ;;  %v31_v19 = vld [vmem:[%s393_s0 + $0x48] sm:$0xff] }
   0x5   :  { %228 = vmatpush3.bf16.xpose.msra.mxu0 %v113_v7  ;;  %56 = vperm.xlu0 %256, %v50_v11   ;;  %v110_v13 = vsel %vm84_vm0, %v44_v6, 0  ;;  %v168_v17 = vld [vmem:[%s396_s3] sm:$0xff]  ;;  %v169_v20 = vld [vmem:[%s396_s3 + $0x8] sm:$0xff]  ;;  %v107_v21 = vsel %vm84_vm0, %v43_v14, 0  ;;  %v170_v23 = vld [vmem:[%s396_s3 + $0x10] sm:$0xff]  ;;  %v206_v11 = vstv %s397_s4 }
   0x6   :  { %248 = vmatprep.subr.msk.bf16.mxu0 %vm84_vm0, %v44_v6  ;;  %66 = vperm.xlu1 %257, %v52_v12   ;;  %v30_v18 = vld [vmem:[%s393_s0 + $0x40] sm:$0xff]  ;;  %v171_v24 = vld [vmem:[%s396_s3 + $0x18] sm:$0xff]  ;;  %v28_v25 = vld [vmem:[%s393_s0 + $0x30] sm:$0xff] }
   0x7   :  { %v42_v22 = vpack.c.bf16 %v31_v19, %v30_v18  ;;  %v29_v26 = vld [vmem:[%s393_s0 + $0x38] sm:$0xff]  ;;  %v26_v29 = vld [vmem:[%s393_s0 + $0x20] sm:$0xff]  ;;  %v27_v30 = vld [vmem:[%s393_s0 + $0x28] sm:$0xff] }
   0x8   :  { %v41_v28 = vpack.c.bf16 %v29_v26, %v28_v25  ;;  %v40_v32 = vpack.c.bf16 %v27_v30, %v26_v29  ;;  %v24_v33 = vld [vmem:[%s393_s0 + $0x10] sm:$0xff]  ;;  %v25_v34 = vld [vmem:[%s393_s0 + $0x18] sm:$0xff]  ;;  %v22_v37 = vld [vmem:[%s393_s0] sm:$0xff] }
   0x9   :  { %61 = vperm.xlu0 %256, %v51_v15   ;;  %v104_v27 = vsel %vm84_vm0, %v42_v22, 0  ;;  %v39_v36 = vpack.c.bf16 %v25_v34, %v24_v33  ;;  %v23_v38 = vld [vmem:[%s393_s0 + $0x8] sm:$0xff] }
   0xa   :  { %71 = vperm.xlu1 %257, %v53_v16   ;;  %v101_v31 = vsel %vm84_vm0, %v41_v28, 0  ;;  %v98_v35 = vsel %vm84_vm0, %v40_v32, 0  ;;  %v38_v40 = vpack.c.bf16 %v23_v38, %v22_v37  ;;  %v259_v42 = vld [vmem:[%s394_s1 + $0x8] sm:$0xff]  }
   0xb   :  { %v95_v39 = vsel %vm84_vm0, %v39_v36, 0 }
   0xc   :  { %v92_v41 = vsel %vm84_vm0, %v38_v40, 0 }
   0xd   :  { %230 = vmatpush3.bf16.xpose.msra.mxu0 %v110_v13  ;;  %174 = vperm.xlu0 %256, %v168_v17  }
   0xe   :  { %249 = vmatprep.subr.msk.bf16.mxu0 %vm84_vm0, %v43_v14  ;;  %179 = vperm.xlu1 %257, %v169_v20  }
  0x11   :  { %184 = vperm.xlu0 %256, %v170_v23  }
  0x12   :  { %189 = vperm.xlu1 %257, %v171_v24  }
  0x15   :  { %232 = vmatpush3.bf16.xpose.msra.mxu0 %v107_v21 }
  0x16   :  { %250 = vmatprep.subr.msk.bf16.mxu0 %vm84_vm0, %v42_v22 }
  0x1d   :  { %234 = vmatpush3.bf16.xpose.msra.mxu0 %v104_v27 }
  0x1e   :  { %251 = vmatprep.subr.msk.bf16.mxu0 %vm84_vm0, %v41_v28 }
  0x25   :  { %236 = vmatpush3.bf16.xpose.msra.mxu0 %v101_v31 }
  0x26   :  { %252 = vmatprep.subr.msk.bf16.mxu0 %vm84_vm0, %v40_v32 }
  0x2d   :  { %238 = vmatpush3.bf16.xpose.msra.mxu0 %v98_v35 }
  0x2e   :  { %253 = vmatprep.subr.msk.bf16.mxu0 %vm84_vm0, %v39_v36 }
  0x35   :  { %240 = vmatpush3.bf16.xpose.msra.mxu0 %v95_v39 }
  0x36   :  { %254 = vmatprep.subr.msk.bf16.mxu0 %vm84_vm0, %v38_v40 }
  0x3d   :  { %242 = vmatpush3.bf16.xpose.msra.mxu0 %v92_v41 }
  0x44   :  { %244 = vmatmul.mubr.msk.bf16.vlgmr.msra.gmra.mxu0 %vm84_vm0, %v259_v42 }
  0x80   :  { %v57_v43 = vpop.permute.xlu0 %56 }
  0x81   :  { %v67_v44 = vpop.permute.xlu1 %66 }
  0x84   :  { %v62_v45 = vpop.permute.xlu0 %61 }
  0x85   :  { %v72_v47 = vpop.permute.xlu1 %71 }
  0x88   :  { %v175_v52 = vpop.permute.xlu0 %174 }
  0x89   :  { %v180_v57 = vpop.permute.xlu1 %179 }
  0x8c   :  { %v185_v63 = vpop.permute.xlu0 %184 }
  0x8d   :  { %v190_v2 = vpop.permute.xlu1 %189 }
 0x104   :  { %v245_v46 = vpop.f32.mrf.mxu0 }
 0x105   :  { %v158_v51 = vadd.f32 %v245_v46, %v67_v44 }
 0x106   :  { %v149_v48 = vpop.f32.mrf.mxu0 }
 0x107   :  { %v150_v49 = vadd.f32 %v149_v48, %v57_v43  ;;  %v166_v58 = vmax.f32 %v158_v51, 0.0 }
 0x108   :  { %v246_v50 = vpop.f32.mrf.mxu0 }
 0x109   :  { %v164_v54 = vmax.f32 %v150_v49, 0.0  ;;  %v161_v55 = vadd.f32 %v246_v50, %v72_v47  ;;  %v194_v0 = vmul.f32 %v185_v63, %v166_v58 }
 0x10a   :  { %v152_v53 = vpop.f32.mrf.mxu0 }
 0x10b   :  { %v153_v56 = vadd.f32 %v152_v53, %v62_v45  ;;  %v192_v60 = vmul.f32 %v175_v52, %v164_v54  ;;  %v167_v61 = vmax.f32 %v161_v55, 0.0 }
 0x10d   :  { %v165_v59 = vmax.f32 %v153_v56, 0.0  ;;  %v195_v3 = vmul.f32 %v190_v2, %v167_v61 }
 0x10f   :  { %v193_v62 = vmul.f32 %v180_v57, %v165_v59 }
 0x111   :  { %v196_v1 = vadd.f32 %v193_v62, %v192_v60 }
 0x113   :  { %v197_v4 = vadd.f32 %v196_v1, %v194_v0 }
 0x115   :  { %v198_v5 = vadd.f32 %v197_v4, %v195_v3 }
 0x117   :  { %v199_v6 = vrot.slane %v198_v5, 4 }
 0x119   :  { %v200_v7 = vadd.f32 %v199_v6, %v198_v5 }
 0x11b   :  { %v201_v8 = vrot.slane %v200_v7, 2 }
 0x11d   :  { %v202_v9 = vadd.f32 %v201_v8, %v200_v7 }
 0x11f   :  { %v203_v10 = vrot.slane %v202_v9, 1 }
 0x121   :  { %v204_v12 = vadd.f32 %v203_v10, %v202_v9 }
 0x123   :  { %v207_v13 = vadd.f32 %v206_v11, %v204_v12 }
 0x125   :  { %208 = vst [vmem:[%s398_s5] sm:$0x1] %v207_v13 }

</bundles_post_ra>
